<compile_context>
chip_gen: v5e
topology: v5e:2x2
jax: 0.10.0
libtpu: 0.0.40
codegen_flags: <defaults>
</compile_context>

<pallas_src>
import functools

import jax
import jax.numpy as jnp
from jax.experimental import pallas as pl
from jax.experimental.pallas import tpu as pltpu


# ---------------------------------------------------------------------------
# Pass 1: fused all-head projection  proj = seq @ [W_fts | w_1 | w_2^T | 0] + bias_row
# ---------------------------------------------------------------------------
def _proj_kernel(seq_ref, wcat_ref, brow_ref, proj_ref):
    """seq_ref: (B, TN, D) bf16; wcat_ref: (D, H*KP) bf16; brow_ref: (1, H*KP) f32;
    proj_ref: (B, TN, H*KP) bf16."""
    p = jnp.einsum('bnd,dk->bnk', seq_ref[...], wcat_ref[...],
                   preferred_element_type=jnp.float32)          # (B, TN, H*KP)
    p = p + brow_ref[...][None, :, :]                           # fold b1/b2 biases
    proj_ref[...] = p.astype(proj_ref.dtype)


# ---------------------------------------------------------------------------
# Pass 2: per-head attention (softmax over batch axis, faithful to the module)
# ---------------------------------------------------------------------------
def _attn_kernel(projk_ref, projq_ref, hbias_ref, out_ref,
                 *, num_heads, out_width, kp):
    """projk_ref: (B, N, H*KP) bf16 — all key rows (constant block, DMA'd once)
    projq_ref : (B, TQ, H*KP) bf16 — the query rows of this tile
    hbias_ref : (H,) f32 in SMEM    — AttnHead.bias (scalar per head)
    out_ref   : (B, TQ, O) f32      — unpadded output tile."""
    projk = projk_ref[...]
    projq = projq_ref[...]
    o = out_width

    acc = jnp.zeros(out_ref.shape, jnp.float32)
    # H is small (<= ~4) so the head loop stays unrolled for LLO visibility.
    # TODO(synk): if H grows, move heads to an "arbitrary" grid axis with a
    # VMEM scratch accumulator to bound vreg/VMEM pressure.
    for h in range(num_heads):
        base = h * kp
        # f_1 / f_2 columns already include their biases (folded in pass 1).
        f1 = projq[:, :, base + o:base + o + 1].astype(jnp.float32)   # (B, TQ, 1)
        f2 = projk[:, :, base + o + 1].astype(jnp.float32)            # (B, N)
        # logits = f_1 + f_2.permute(0, 2, 1)
        logits = f1 + f2[:, None, :]                                  # (B, TQ, N)
        # F.leaky_relu default negative_slope = 0.01
        lrelu = jnp.where(logits >= 0, logits, 0.01 * logits)
        # F.softmax with implicit dim on a 3-D tensor resolves to dim=0 (the
        # batch axis) in PyTorch — reproduced exactly here.
        m = jnp.max(lrelu, axis=0, keepdims=True)
        e = jnp.exp(lrelu - m)
        denom = jnp.sum(e, axis=0, keepdims=True)
        coefs = e * pl.reciprocal(denom, approx=True)                 # EUP, not VPU divide

        # vals = coefs @ seq_fts — done on the full 128-lane head slab (lane
        # aligned, bf16 MXU); padded / f1 / f2 result columns are sliced off
        # before the accumulate.
        slab = projk[:, :, base:base + kp]                            # (B, N, KP) bf16
        vals = jnp.einsum('bqm,bmk->bqk', coefs.astype(jnp.bfloat16), slab,
                          preferred_element_type=jnp.float32)         # (B, TQ, KP)
        acc = acc + jnp.maximum(vals[..., :o] + hbias_ref[h], 0.0)    # ACT_FN = relu

    out_ref[...] = acc * (1.0 / num_heads)
    # TODO(synk): residual=True branch (identity / linear_layer_residual add)
    # is not implemented; the module's default residual=False is reproduced.


# ---------------------------------------------------------------------------
# Wrapper
# ---------------------------------------------------------------------------
def _pick_tile(n):
    """Largest sublane-aligned tile that still yields >= 2 grid steps (so the
    'parallel' axis can shard across v7x's two TensorCores); falls back to a
    single full tile for tiny / awkward n."""
    for cand in (1024, 512, 256, 128, 64, 32, 16):
        if n % cand == 0 and n // cand >= 2:
            return cand
    return n


def _vmem_limit_bytes():
    """~75% of physical VMEM (128 MiB -> 96 on v5e/v6e, 64 MiB -> 48 on v7x)."""
    try:
        cap = int(pltpu.get_tpu_info().vmem_capacity_bytes)
    except Exception:
        return None
    return (cap // 4) * 3


def multi_attn_head(seq, wfts, w1, w2, b1, b2, hbias):
    """seq: (B,N,D); wfts: (H,D,O); w1: (H,D,1); w2: (H,1,D); b1,b2,hbias: (H,)."""
    B, N, D = seq.shape
    H, _, O = wfts.shape
    KP = max(128, ((O + 2 + 127) // 128) * 128)     # lane-dense per-head width
    HK = H * KP

    # Fused per-head weights, head-major along lanes: [W_fts | w_1 | w_2^T | 0].
    pad = jnp.zeros((H, D, KP - O - 2), jnp.float32)
    wcat = jnp.concatenate(
        [wfts.astype(jnp.float32),
         w1.astype(jnp.float32),
         jnp.transpose(w2, (0, 2, 1)).astype(jnp.float32),
         pad], axis=-1)                              # (H, D, KP)
    wcat = jnp.transpose(wcat, (1, 0, 2)).reshape(D, HK).astype(jnp.bfloat16)

    # f_1 / f_2 biases folded into the projection as an additive lane row.
    brow = jnp.zeros((H, KP), jnp.float32)
    brow = brow.at[:, O].set(b1).at[:, O + 1].set(b2)
    brow = brow.reshape(1, HK)

    seq_bf16 = seq.astype(jnp.bfloat16)
    vmem_limit = _vmem_limit_bytes()

    # ---------------- pass 1: projection ----------------
    TN = _pick_tile(N)
    n_n = N // TN
    proj_cost = pl.CostEstimate(
        flops=2 * B * N * D * HK,
        transcendentals=0,
        bytes_accessed=2 * B * N * D + 2 * D * HK + 4 * HK + 2 * B * N * HK)
    proj = pl.pallas_call(
        _proj_kernel,
        out_shape=jax.ShapeDtypeStruct((B, N, HK), jnp.bfloat16),
        grid=(n_n,),
        in_specs=[
            pl.BlockSpec((B, TN, D), lambda n: (0, n, 0)),       # node tile
            pl.BlockSpec((D, HK), lambda n: (0, 0)),             # fused weights (DMA once)
            pl.BlockSpec((1, HK), lambda n: (0, 0)),             # bias row (DMA once)
        ],
        out_specs=pl.BlockSpec((B, TN, HK), lambda n: (0, n, 0)),
        compiler_params=pltpu.CompilerParams(
            dimension_semantics=("parallel",),
            vmem_limit_bytes=vmem_limit),
        cost_estimate=proj_cost,
    )(seq_bf16, wcat, brow)

    # ---------------- pass 2: attention ----------------
    TQ = _pick_tile(N)
    n_q = N // TQ
    kernel = functools.partial(_attn_kernel, num_heads=H, out_width=O, kp=KP)
    attn_cost = pl.CostEstimate(
        flops=2 * H * B * N * N * KP,
        transcendentals=H * B * N * N,
        # full-key proj block has a constant index_map -> DMA'd once; query
        # tiles cover proj once across the grid; plus the (B,N,O) f32 output.
        bytes_accessed=2 * (2 * B * N * HK) + 4 * B * N * O + 4 * H)
    out = pl.pallas_call(
        kernel,
        out_shape=jax.ShapeDtypeStruct((B, N, O), jnp.float32),
        grid=(n_q,),
        in_specs=[
            pl.BlockSpec((B, N, HK), lambda q: (0, 0, 0)),       # all key rows (DMA once)
            pl.BlockSpec((B, TQ, HK), lambda q: (0, q, 0)),      # query rows of this tile
            pl.BlockSpec(memory_space=pltpu.MemorySpace.SMEM),   # per-head bias
        ],
        out_specs=pl.BlockSpec((B, TQ, O), lambda q: (0, q, 0)),
        compiler_params=pltpu.CompilerParams(
            dimension_semantics=("parallel",),
            vmem_limit_bytes=vmem_limit),
        cost_estimate=attn_cost,
    )(proj, proj, hbias)
    # TODO(synk): for very large N, additionally tile the key axis of pass 2
    # ("arbitrary" reduction axis + VMEM accumulator; key tiles are independent
    # since the softmax reduces over batch) and mark the constant-index-map
    # blocks pipeline_mode=pl.Buffered(1) to cap VMEM on v7x's 64 MiB part.
    return out


# ---------------------------------------------------------------------------
# Pure-JAX reference mirroring the PyTorch forward.
# ---------------------------------------------------------------------------
def multi_attn_head_reference(seq, wfts, w1, w2, b1, b2, hbias):
    H = wfts.shape[0]
    outs = []
    for h in range(H):
        seq_fts = jnp.einsum('bnd,do->bno', seq, wfts[h])
        f1 = jnp.einsum('bnd,dk->bnk', seq, w1[h]) + b1[h]          # (B,N,1)
        f2 = jnp.einsum('bnd,kd->bnk', seq, w2[h]) + b2[h]          # (B,N,1)
        logits = f1 + jnp.transpose(f2, (0, 2, 1))                  # (B,N,N)
        lrelu = jnp.where(logits >= 0, logits, 0.01 * logits)
        coefs = jax.nn.softmax(lrelu, axis=0)   # implicit-dim softmax on 3-D
        vals = jnp.einsum('bnm,bmo->bno', coefs, seq_fts)
        outs.append(jax.nn.relu(vals + hbias[h]))
    return sum(outs) / H


if __name__ == "__main__":
    key = jax.random.PRNGKey(0)
    B, N = 2, 8
    # linear_layer_f_1/f_2 are declared with in_features=out_size but applied
    # to `seq`, so the module only runs when input_size == out_size.
    D = O = 32
    H = 4                       # head_nums

    ks = jax.random.split(key, 6)
    seq = jax.random.normal(ks[0], (B, N, D), dtype=jnp.float32)
    bound = 1.0 / (D ** 0.5)
    wfts = jax.random.uniform(ks[1], (H, D, O), jnp.float32, -bound, bound)
    w1 = jax.random.uniform(ks[2], (H, D, 1), jnp.float32, -bound, bound)
    w2 = jax.random.uniform(ks[3], (H, 1, D), jnp.float32, -bound, bound)
    b1 = jax.random.uniform(ks[4], (H,), jnp.float32, -bound, bound)
    b2 = jax.random.uniform(ks[5], (H,), jnp.float32, -bound, bound)
    hbias = jnp.zeros((H,), jnp.float32)    # AttnHead.weight_init zeros self.bias

    out = jax.block_until_ready(
        multi_attn_head(seq, wfts, w1, w2, b1, b2, hbias))
    ref = multi_attn_head_reference(seq, wfts, w1, w2, b1, b2, hbias)

    assert out.shape == (B, N, O)
    assert bool(jnp.all(jnp.isfinite(out)))
    assert bool(jnp.allclose(out, ref, rtol=5e-2, atol=5e-2)), (
        "max abs diff: %f" % float(jnp.max(jnp.abs(out - ref))))
    print("KERNEL_OK")
</pallas_src>

<mosaic_0001>
module attributes {stable_mosaic.version = 11 : i64} {
  func.func @_proj_kernel(%arg0: i32, %arg1: memref<2x8x32xbf16, #tpu.memory_space<vmem>>, %arg2: memref<32x512xbf16, #tpu.memory_space<vmem>>, %arg3: memref<1x512xf32, #tpu.memory_space<vmem>>, %arg4: memref<2x8x512xbf16, #tpu.memory_space<vmem>>) attributes {dimension_semantics = [#tpu.dimension_semantics<parallel>], iteration_bounds = array<i64: 1>, scalar_prefetch = 0 : i64, scratch_operands = 0 : i64, tpu.core_type = #tpu.core_type<tc>, window_params = [{transform_indices = @transform_0, window_bounds = array<i64: 2, 8, 32>}, {pipeline_mode = #tpu.pipeline_mode<synchronous>, transform_indices = @transform_1, window_bounds = array<i64: 32, 512>}, {pipeline_mode = #tpu.pipeline_mode<synchronous>, transform_indices = @transform_2, window_bounds = array<i64: 1, 512>}, {transform_indices = @transform_3, window_bounds = array<i64: 2, 8, 512>}]} {
    %c0 = arith.constant 0 : index
    %c0_0 = arith.constant 0 : index
    %c0_1 = arith.constant 0 : index
    %0 = vector.load %arg1[%c0, %c0_0, %c0_1] : memref<2x8x32xbf16, #tpu.memory_space<vmem>>, vector<2x8x32xbf16>
    %c0_2 = arith.constant 0 : index
    %c0_3 = arith.constant 0 : index
    %1 = vector.load %arg2[%c0_2, %c0_3] : memref<32x512xbf16, #tpu.memory_space<vmem>>, vector<32x512xbf16>
    "tpu.trace_start"() <{level = 10 : i32, message = "bnd,dk->bnk"}> : () -> ()
    %cst = arith.constant dense<0.000000e+00> : vector<2x8x512xf32>
    %2 = tpu.matmul %0, %1, %cst {dimension_numbers = #tpu.dot_dimension_numbers<[2], [0], [0, 1], [1], [0, 0, 0, 1, 1, 1], [], []>} : vector<2x8x32xbf16>, vector<32x512xbf16>, vector<2x8x512xf32> -> vector<2x8x512xf32>
    "tpu.trace_stop"() : () -> ()
    %c0_4 = arith.constant 0 : index
    %c0_5 = arith.constant 0 : index
    %3 = vector.load %arg3[%c0_4, %c0_5] : memref<1x512xf32, #tpu.memory_space<vmem>>, vector<1x512xf32>
    %4 = vector.shape_cast %3 : vector<1x512xf32> to vector<1x1x512xf32>
    %5 = vector.broadcast %4 : vector<1x1x512xf32> to vector<2x8x512xf32>
    %6 = arith.addf %2, %5 : vector<2x8x512xf32>
    %7 = arith.truncf %6 : vector<2x8x512xf32> to vector<2x8x512xbf16>
    %c0_6 = arith.constant 0 : index
    %c0_7 = arith.constant 0 : index
    %c0_8 = arith.constant 0 : index
    %8 = vector.load %arg4[%c0_6, %c0_7, %c0_8] : memref<2x8x512xbf16, #tpu.memory_space<vmem>>, vector<2x8x512xbf16>
    tpu.vector_store %arg4[%c0_6, %c0_7, %c0_8], %7 {strides = array<i32>} : memref<2x8x512xbf16, #tpu.memory_space<vmem>>, vector<2x8x512xbf16>,
    return
  }
  func.func @transform_0(%arg0: i32) -> (i32, i32, i32) {
    %c0_i32 = arith.constant 0 : i32
    %c0_i32_0 = arith.constant 0 : i32
    %c0_i32_1 = arith.constant 0 : i32
    return %c0_i32, %arg0, %c0_i32_0 : i32, i32, i32
  }
  func.func @transform_1(%arg0: i32) -> (i32, i32) {
    %c0_i32 = arith.constant 0 : i32
    %c0_i32_0 = arith.constant 0 : i32
    %c0_i32_1 = arith.constant 0 : i32
    return %c0_i32, %c0_i32_0 : i32, i32
  }
  func.func @transform_2(%arg0: i32) -> (i32, i32) {
    %c0_i32 = arith.constant 0 : i32
    %c0_i32_0 = arith.constant 0 : i32
    %c0_i32_1 = arith.constant 0 : i32
    return %c0_i32, %c0_i32_0 : i32, i32
  }
  func.func @transform_3(%arg0: i32) -> (i32, i32, i32) {
    %c0_i32 = arith.constant 0 : i32
    %c0_i32_0 = arith.constant 0 : i32
    %c0_i32_1 = arith.constant 0 : i32
    return %c0_i32, %arg0, %c0_i32_0 : i32, i32, i32
  }
}

</mosaic_0001>

<bundles_post_ra>
// kernel: tpu_custom_call.1
= control target key start
LH: loop header
LB: loop body
LE: loop exit
PB: predicated region body
PF: predicated region fallthrough
CT: control target
= control target key end

     0   :  { %8 = vsyncpa [#allocation3], 0  ;;  %s419_s0 = inlined_call_operand.hbm [shape: bf16[2,8,32], index: 0, kind: input, shape index: {}]   ;;  %s420_s1 = inlined_call_operand.hbm [shape: bf16[32,512], index: 1, kind: input, shape index: {}]   ;;  %s421_s2 = inlined_call_operand.hbm [shape: f32[1,512], index: 2, kind: input, shape index: {}]   ;;  %s422_s3 = inlined_call_operand.hbm [shape: bf16[2,8,512], index: 3, kind: output, shape index: {}]  }
   0x1   :  { %9 = vsyncpa [#allocation6], 0  ;;  %s28_s14 = sshll.u32 %s420_s1, 4  ;;  %s29_s14 = int_to_ptr.hbm [resolvable:$true] %s28_s14 }
   0x2   :  { %10 = vsyncpa [#allocation4], 0  ;;  %s373_s15 = smov [#allocation5]   ;;  %s15_s19 = sshll.u32 %s419_s0, 4  ;;  %s16_s19 = int_to_ptr.hbm [resolvable:$true] %s15_s19 }
   0x3   :  { %s30_s16 = sshll.u32 %s373_s15, 4  ;;  %s374_s20 = smov 256   ;;  %s31_s16 = int_to_ptr.vmem [resolvable:$true] %s30_s16 }
   0x4   :  { %s375_s21 = smov 16   ;;  %s376_s22 = smov [#allocation2]  }
   0x5   :  { %36 = dma.hbm_to_vmem [thread:$0]  %s29_s14, 1024, %s31_s16, [#allocation6], %s374_s20, %s374_s20, %s375_s21  }
   0x6   :  { %s17_s23 = sshll.u32 %s376_s22, 4  ;;  %s377_s1 = smov 64   ;;  %s18_s23 = int_to_ptr.vmem [resolvable:$true] %s17_s23 }
   0x7   :  { %s378_s24 = smov 4   ;;  %s42_s27 = sshll.u32 %s421_s2, 4  ;;  %s43_s27 = int_to_ptr.hbm [resolvable:$true] %s42_s27 }
   0x8   :  { %23 = dma.hbm_to_vmem [thread:$0]  %s16_s19, 128, %s18_s23, [#allocation3], %s377_s1, %s377_s1, %s378_s24  }
   0x9   :  { %s379_s28 = smov [#allocation7]  }
   0xa   :  { %s44_s0 = sshll.u32 %s379_s28, 4  ;;  %s45_s0 = int_to_ptr.vmem [resolvable:$true] %s44_s0 }
   0xb   :  { %47 = dma.hbm_to_vmem [thread:$0]  %s43_s27, 64, %s45_s0, [#allocation6]  }
   0xc   :  { %367 = dma.done.wait [#allocation3], 128  }
   0xd   :  { %368 = vsyncadd [#allocation3], 4294967168 }
   0xe   :  { %369 = dma.done.wait [#allocation6], 1088  }
   0xf   :  { %370 = vsyncadd [#allocation6], 4294966208  ;;  %v236_v0 = vld [vmem:[#allocation5 + $0x20] sm:$0xf]  ;;  %v261_v1 = vld [vmem:[#allocation5 + $0x2c] sm:$0xf0] }
  0x10   :  { %v259_v2 = vld [vmem:[#allocation5 + $0x24] sm:$0xf]  ;;  %v237_v3 = vor.u32 %v261_v1, %v236_v0  ;;  %v238_v4 = vld [vmem:[#allocation5 + $0x30] sm:$0xf0]  ;;  %v244_v5 = vld [vmem:[#allocation5 + $0x28] sm:$0xf] }
  0x11   :  { %v262_v6 = vld [vmem:[#allocation5 + $0x34] sm:$0xf0]  ;;  %v241_v7 = vor.u32 %v259_v2, %v238_v4  ;;  %v260_v9 = vld [vmem:[#allocation5 + $0x2c] sm:$0xf]  ;;  %v246_v10 = vld [vmem:[#allocation5 + $0x38] sm:$0xf0] }
  0x12   :  { %v245_v8 = vor.u32 %v262_v6, %v244_v5  ;;  %v220_v11 = vld [vmem:[#allocation5] sm:$0xf]  ;;  %136 = vmatpush.bf16.msra.mxu0 %v237_v3  ;;  %v249_v12 = vor.u32 %v260_v9, %v246_v10  ;;  %v257_v13 = vld [vmem:[#allocation5 + $0xc] sm:$0xf0]  ;;  %v255_v14 = vld [vmem:[#allocation5 + $0x4] sm:$0xf] }
  0x13   :  { %v222_v15 = vld [vmem:[#allocation5 + $0x10] sm:$0xf0]  ;;  %150 = vmatpush.bf16.msra.mxu1 %v241_v7  ;;  %v221_v16 = vor.u32 %v257_v13, %v220_v11  ;;  %v228_v18 = vld [vmem:[#allocation5 + $0x8] sm:$0xf]  ;;  %v258_v19 = vld [vmem:[#allocation5 + $0x14] sm:$0xf0] }
  0x14   :  { %164 = vmatpush.bf16.msra.mxu2 %v245_v8  ;;  %v225_v17 = vor.u32 %v255_v14, %v222_v15  ;;  %v256_v20 = vld [vmem:[#allocation5 + $0xc] sm:$0xf]  ;;  %178 = vmatpush.bf16.msra.mxu3 %v249_v12  ;;  %v229_v21 = vor.u32 %v258_v19, %v228_v18  ;;  %v230_v22 = vld [vmem:[#allocation5 + $0x18] sm:$0xf0]  ;;  %vm126_vm0 = vcmask 261120   ;;  %s380_s2 = smov [#allocation8]  }
  0x15   :  { %v233_v23 = vor.u32 %v256_v20, %v230_v22  ;;  %v254_v24 = vld [vmem:[#allocation2] sm:$0xff]  ;;  %v71_v25 = vld [vmem:[#allocation7] sm:$0xf]  ;;  %s198_s29 = sshll.u32 %s380_s2, 4  ;;  %s200_s5 = sshll.u32 %s422_s3, 4  ;;  %s199_s29 = int_to_ptr.vmem [resolvable:$true] %s198_s29  ;;  %s201_s5 = int_to_ptr.hbm [resolvable:$true] %s200_s5 }
  0x16   :  { %137 = vmatpush.bf16.msra.mxu0 %v221_v16  ;;  %v73_v26 = vperm.slane %v71_v25, 0  ;;  %v74_v27 = vperm.slane %v71_v25, 1  ;;  %v75_v33 = vperm.slane %v71_v25, 2  ;;  %v76_v34 = vperm.slane %v71_v25, 3 }
  0x17   :  { %151 = vmatpush.bf16.msra.mxu1 %v225_v17 }
  0x18   :  { %165 = vmatpush.bf16.msra.mxu2 %v229_v21  ;;  %179 = vmatpush.bf16.msra.mxu3 %v233_v23 }
  0x19   :  { %250 = vmatmul.msk.bf16.vlgmr.msra.gmra.mxu0 %vm126_vm0, %v254_v24 }
  0x1a   :  { %251 = vmatmul.msk.bf16.vlgmr.msra.gmra.mxu1 %vm126_vm0, %v254_v24 }
  0x1b   :  { %252 = vmatmul.msk.bf16.vlgmr.msra.gmra.mxu2 %vm126_vm0, %v254_v24  ;;  %253 = vmatmul.msk.bf16.vlgmr.msra.gmra.mxu3 %vm126_vm0, %v254_v24 }
  0x96   :  { %v139_v28 = vpop.f32.mrf.mxu0 }
  0x97   :  { %v140_v29 = vadd.f32 %v139_v28, %v73_v26  ;;  %v153_v30 = vpop.f32.mrf.mxu1 }
  0x98   :  { %v154_v31 = vadd.f32 %v153_v30, %v74_v27 }
  0x9a   :  { %v186_v32 = vpack.c.bf16 %v154_v31, %v140_v29 }
  0x9c   :  { %190 = vst [vmem:[#allocation8] sm:$0xff] %v186_v32 }
  0x9e   :  { %v167_v35 = vpop.f32.mrf.mxu2  ;;  %v181_v37 = vpop.f32.mrf.mxu3 }
  0x9f   :  { %v168_v36 = vadd.f32 %v167_v35, %v75_v33  ;;  %v141_v38 = vpop.f32.mrf.mxu0  ;;  %v182_v39 = vadd.f32 %v181_v37, %v76_v34  ;;  %v155_v41 = vpop.f32.mrf.mxu1 }
  0xa0   :  { %v142_v40 = vadd.f32 %v141_v38, %v73_v26  ;;  %v156_v42 = vadd.f32 %v155_v41, %v74_v27 }
  0xa1   :  { %v187_v43 = vpack.c.bf16 %v182_v39, %v168_v36 }
  0xa2   :  { %v188_v44 = vpack.c.bf16 %v156_v42, %v142_v40 }
  0xa3   :  { %191 = vst [vmem:[#allocation8 + $0x8] sm:$0xff] %v187_v43 }
  0xa4   :  { %192 = vst [vmem:[#allocation8 + $0x10] sm:$0xff] %v188_v44 }
  0xa6   :  { %v169_v45 = vpop.f32.mrf.mxu2  ;;  %v183_v47 = vpop.f32.mrf.mxu3 }
  0xa7   :  { %v170_v46 = vadd.f32 %v169_v45, %v75_v33  ;;  %v184_v48 = vadd.f32 %v183_v47, %v76_v34 }
  0xa9   :  { %v189_v49 = vpack.c.bf16 %v184_v48, %v170_v46 }
  0xab   :  { %193 = vst [vmem:[#allocation8 + $0x18] sm:$0xff] %v189_v49 }
  0xac   :  { %206 = dma.vmem_to_hbm [thread:$0]  %s199_s29, 512, %s201_s5, [#allocation4], %s374_s20, %s374_s20, %s375_s21  }
  0xad   :  { %371 = dma.done.wait [#allocation4], 512  }
  0xae   :  { %372 = vsyncadd [#allocation4], 4294966784 }
  0xaf   :  { %211 = vsyncpa [#allocation3], 1 }
  0xb0   :  { %212 = vsyncpa [#allocation6], 1 }
  0xb1   :  { %213 = vsyncpa [#allocation4], 1 }

</bundles_post_ra>
